<compile_context>
chip_gen: v7x
topology: tpu7x:2x2x1
jax: 0.10.0
libtpu: 0.0.40
codegen_flags: <defaults>
</compile_context>

<pallas_src>
import math
import functools

import jax
import jax.numpy as jnp
from jax.experimental import pallas as pl
from jax.experimental.pallas import tpu as pltpu

LN_EPS = 1e-5


def _round_up(v, m):
    return (v + m - 1) // m * m


# ------------------------------------------------------------------------------------
# Prologue kernel: support_scaled[j, :] = dinv[j] * (x[j, :] @ W)   (row-tiled)
# ------------------------------------------------------------------------------------
def support_kernel(x_ref, w_ref, dinv_ref, sup_ref):
    s = jnp.dot(x_ref[...], w_ref[...], preferred_element_type=jnp.float32)
    sup_ref[...] = dinv_ref[...] * s


# ------------------------------------------------------------------------------------
# Main kernel: for row tile i,
#   out_i = LN( relu( dinv_i * sum_k adj[i,k] @ sup[k] + x_i @ W_self + b ) + x_i )
# grid = (row tiles [parallel], contraction tiles [arbitrary]); VMEM f32 accumulator.
# ------------------------------------------------------------------------------------
def gcn_main_kernel(adj_ref, sup_ref, x_ref, dinv_ref, wself_ref, b_ref,
                    lnw_ref, lnb_ref, out_ref, acc_ref, *, true_f):
    k = pl.program_id(1)

    @pl.when(k == 0)
    def _():
        acc_ref[...] = jnp.zeros_like(acc_ref)

    acc_ref[...] += jnp.dot(adj_ref[...], sup_ref[...],
                            preferred_element_type=jnp.float32)

    @pl.when(k == pl.num_programs(1) - 1)
    def _():
        x = x_ref[...]
        out = dinv_ref[...] * acc_ref[...]                       # D^{-1/2} row scale
        out += jnp.dot(x, wself_ref[...], preferred_element_type=jnp.float32)
        out += b_ref[...]
        out = jnp.maximum(out, 0.0)                              # activation = ReLU
        # dropout: eval-mode identity
        out = out + x                                            # residual
        # one-pass LayerNorm over the TRUE feature width (padded columns are exactly 0)
        inv_f = 1.0 / true_f
        mean = jnp.sum(out, axis=-1, keepdims=True) * inv_f
        meansq = jnp.sum(out * out, axis=-1, keepdims=True) * inv_f
        var = jnp.maximum(meansq - mean * mean, 0.0)
        normed = (out - mean) * jax.lax.rsqrt(var + LN_EPS)
        out_ref[...] = normed * lnw_ref[...] + lnb_ref[...]


@jax.jit
def gcn_bs_forward(x, adj, weight, self_weight, bias, ln_weight, ln_bias):
    n, f = x.shape
    f32 = jnp.float32

    # Lane-dense padding of the feature axis and node axis.
    fp = _round_up(max(f, 128), 128)
    n_pad = _round_up(max(n, 128), 128)
    tm = 256 if n_pad % 256 == 0 else 128                         # output-row tile
    tk = 512 if n_pad % 512 == 0 else (256 if n_pad % 256 == 0 else 128)  # contraction tile

    xp = jnp.zeros((n_pad, fp), f32).at[:n, :f].set(x.astype(f32))
    adjp = jnp.zeros((n_pad, n_pad), f32).at[:n, :n].set(adj.astype(f32))
    wp = jnp.zeros((fp, fp), f32).at[:f, :f].set(weight.astype(f32))
    swp = jnp.zeros((fp, fp), f32).at[:f, :f].set(self_weight.astype(f32))
    bp = jnp.zeros((1, fp), f32).at[0, :f].set(bias.astype(f32))
    lnwp = jnp.zeros((1, fp), f32).at[0, :f].set(ln_weight.astype(f32))
    lnbp = jnp.zeros((1, fp), f32).at[0, :f].set(ln_bias.astype(f32))

    # Degree / D^{-1/2} hoisted out of the kernel (python builtin sum(adj, 1) == 1 + col-sums).
    deg = 1.0 + jnp.sum(adjp, axis=0)
    dinv = (deg ** -0.5).reshape(n_pad, 1)

    # --- prologue: support_scaled = dinv * (x @ W), row-tiled ------------------------
    sup = pl.pallas_call(
        support_kernel,
        out_shape=jax.ShapeDtypeStruct((n_pad, fp), f32),
        grid=(n_pad // tm,),
        in_specs=[
            pl.BlockSpec((tm, fp), lambda i: (i, 0)),   # x rows
            pl.BlockSpec((fp, fp), lambda i: (0, 0)),   # W (resident)
            pl.BlockSpec((tm, 1), lambda i: (i, 0)),    # dinv rows
        ],
        out_specs=pl.BlockSpec((tm, fp), lambda i: (i, 0)),
        compiler_params=pltpu.CompilerParams(
            dimension_semantics=("parallel",),
            vmem_limit_bytes=32 * 1024 * 1024),
    )(xp, wp, dinv)

    # --- main: tiled adj @ support_scaled with fused epilogue ------------------------
    grid = (n_pad // tm, n_pad // tk)
    flops = 2 * n_pad * n_pad * fp + 2 * n_pad * fp * fp
    bytes_accessed = 4 * (n_pad * n_pad + 4 * n_pad * fp + fp * fp)

    outp = pl.pallas_call(
        functools.partial(gcn_main_kernel, true_f=float(f)),
        out_shape=jax.ShapeDtypeStruct((n_pad, fp), f32),
        grid_spec=pltpu.PrefetchScalarGridSpec(
            num_scalar_prefetch=0,
            grid=grid,
            in_specs=[
                pl.BlockSpec((tm, tk), lambda i, k: (i, k)),   # adj tile
                pl.BlockSpec((tk, fp), lambda i, k: (k, 0)),   # scaled support rows
                pl.BlockSpec((tm, fp), lambda i, k: (i, 0)),   # x rows (self-loop + residual)
                pl.BlockSpec((tm, 1), lambda i, k: (i, 0)),    # dinv rows (output scale)
                pl.BlockSpec((fp, fp), lambda i, k: (0, 0)),   # self weight (resident)
                pl.BlockSpec((1, fp), lambda i, k: (0, 0)),    # bias
                pl.BlockSpec((1, fp), lambda i, k: (0, 0)),    # LN weight
                pl.BlockSpec((1, fp), lambda i, k: (0, 0)),    # LN bias
            ],
            out_specs=pl.BlockSpec((tm, fp), lambda i, k: (i, 0)),
            scratch_shapes=[pltpu.VMEM((tm, fp), jnp.float32)],
        ),
        compiler_params=pltpu.CompilerParams(
            dimension_semantics=("parallel", "arbitrary"),
            vmem_limit_bytes=32 * 1024 * 1024),
        cost_estimate=pl.CostEstimate(
            flops=flops, transcendentals=n_pad, bytes_accessed=bytes_accessed),
    )(adjp, sup, xp, dinv, swp, bp, lnwp, lnbp)

    return outp[:n, :f]


def reference_forward(x, adj, weight, self_weight, bias, ln_weight, ln_bias):
    """Pure-JAX reference mirroring the PyTorch module (eval mode)."""
    deg = jnp.sum(adj, axis=0) + 1.0
    dinv = deg ** (-0.5)
    d_mat = jnp.diag(dinv)
    adj_n = d_mat @ adj @ d_mat
    out = adj_n @ (x @ weight) + x @ self_weight + bias
    out = jnp.maximum(out, 0.0) + x
    mean = jnp.mean(out, axis=-1, keepdims=True)
    var = jnp.mean((out - mean) ** 2, axis=-1, keepdims=True)
    return (out - mean) / jnp.sqrt(var + LN_EPS) * ln_weight + ln_bias


if __name__ == "__main__":
    # Small shapes: N nodes, in_features == out_features (required by the residual).
    N = 64
    F = 32

    key = jax.random.PRNGKey(0)
    k_x, k_adj, k_w, k_sw, k_b = jax.random.split(key, 5)

    x = jax.random.normal(k_x, (N, F), dtype=jnp.float32)
    adj = jax.random.uniform(k_adj, (N, N), dtype=jnp.float32)

    # Deterministic parameter init (shapes from __init__):
    #   weight, self_weight: (in, out); kaiming_uniform_(a=sqrt(5))
    #   bias: uniform(-1/sqrt(fan_in), 1/sqrt(fan_in)); LayerNorm: ones / zeros.
    fan_in = F
    gain = math.sqrt(2.0 / (1.0 + 5.0))
    w_bound = gain * math.sqrt(3.0 / fan_in)
    weight = jax.random.uniform(k_w, (F, F), jnp.float32, -w_bound, w_bound)
    self_weight = jax.random.uniform(k_sw, (F, F), jnp.float32, -w_bound, w_bound)
    b_bound = 1.0 / math.sqrt(fan_in)
    bias = jax.random.uniform(k_b, (F,), jnp.float32, -b_bound, b_bound)
    ln_weight = jnp.ones((F,), jnp.float32)
    ln_bias = jnp.zeros((F,), jnp.float32)

    out = gcn_bs_forward(x, adj, weight, self_weight, bias, ln_weight, ln_bias)
    out = jax.block_until_ready(out)

    ref = reference_forward(x, adj, weight, self_weight, bias, ln_weight, ln_bias)
    assert out.shape == (N, F)
    assert jnp.allclose(out, ref, atol=2e-4, rtol=2e-4), "mismatch vs pure-JAX reference"

    print("KERNEL_OK")
</pallas_src>

<mosaic_0001>
module attributes {stable_mosaic.version = 11 : i64} {
  func.func @support_kernel(%arg0: i32, %arg1: memref<128x128xf32, #tpu.memory_space<vmem>>, %arg2: memref<128x128xf32, #tpu.memory_space<vmem>>, %arg3: memref<128x1xf32, #tpu.memory_space<vmem>>, %arg4: memref<128x128xf32, #tpu.memory_space<vmem>>) attributes {dimension_semantics = [#tpu.dimension_semantics<parallel>], iteration_bounds = array<i64: 1>, scalar_prefetch = 0 : i64, scratch_operands = 0 : i64, tpu.core_type = #tpu.core_type<tc>, window_params = [{transform_indices = @transform_0, window_bounds = array<i64: 128, 128>}, {pipeline_mode = #tpu.pipeline_mode<synchronous>, transform_indices = @transform_1, window_bounds = array<i64: 128, 128>}, {transform_indices = @transform_2, window_bounds = array<i64: 128, 1>}, {transform_indices = @transform_3, window_bounds = array<i64: 128, 128>}]} {
    %c0 = arith.constant 0 : index
    %c0_0 = arith.constant 0 : index
    %0 = vector.load %arg1[%c0, %c0_0] : memref<128x128xf32, #tpu.memory_space<vmem>>, vector<128x128xf32>
    %c0_1 = arith.constant 0 : index
    %c0_2 = arith.constant 0 : index
    %1 = vector.load %arg2[%c0_1, %c0_2] : memref<128x128xf32, #tpu.memory_space<vmem>>, vector<128x128xf32>
    %cst = arith.constant dense<0.000000e+00> : vector<128x128xf32>
    %2 = tpu.matmul %0, %1, %cst {dimension_numbers = #tpu.dot_dimension_numbers<[1], [0], [0], [1], [0, 0, 1, 1], [], []>} : vector<128x128xf32>, vector<128x128xf32>, vector<128x128xf32> -> vector<128x128xf32>
    %c0_3 = arith.constant 0 : index
    %c0_4 = arith.constant 0 : index
    %3 = vector.load %arg3[%c0_3, %c0_4] : memref<128x1xf32, #tpu.memory_space<vmem>>, vector<128x1xf32>
    %4 = vector.broadcast %3 : vector<128x1xf32> to vector<128x128xf32>
    %5 = arith.mulf %4, %2 : vector<128x128xf32>
    %c0_5 = arith.constant 0 : index
    %c0_6 = arith.constant 0 : index
    %6 = vector.load %arg4[%c0_5, %c0_6] : memref<128x128xf32, #tpu.memory_space<vmem>>, vector<128x128xf32>
    tpu.vector_store %arg4[%c0_5, %c0_6], %5 {strides = array<i32>} : memref<128x128xf32, #tpu.memory_space<vmem>>, vector<128x128xf32>,
    return
  }
  func.func @transform_0(%arg0: i32) -> (i32, i32) {
    %c0_i32 = arith.constant 0 : i32
    %c0_i32_0 = arith.constant 0 : i32
    return %arg0, %c0_i32 : i32, i32
  }
  func.func @transform_1(%arg0: i32) -> (i32, i32) {
    %c0_i32 = arith.constant 0 : i32
    %c0_i32_0 = arith.constant 0 : i32
    %c0_i32_1 = arith.constant 0 : i32
    return %c0_i32, %c0_i32_0 : i32, i32
  }
  func.func @transform_2(%arg0: i32) -> (i32, i32) {
    %c0_i32 = arith.constant 0 : i32
    %c0_i32_0 = arith.constant 0 : i32
    return %arg0, %c0_i32 : i32, i32
  }
  func.func @transform_3(%arg0: i32) -> (i32, i32) {
    %c0_i32 = arith.constant 0 : i32
    %c0_i32_0 = arith.constant 0 : i32
    return %arg0, %c0_i32 : i32, i32
  }
}

module attributes {stable_mosaic.version = 11 : i64} {
  func.func @gcn_main_kernel(%arg0: i32, %arg1: i32, %arg2: memref<128x128xf32, #tpu.memory_space<vmem>>, %arg3: memref<128x128xf32, #tpu.memory_space<vmem>>, %arg4: memref<128x128xf32, #tpu.memory_space<vmem>>, %arg5: memref<128x1xf32, #tpu.memory_space<vmem>>, %arg6: memref<128x128xf32, #tpu.memory_space<vmem>>, %arg7: memref<1x128xf32, #tpu.memory_space<vmem>>, %arg8: memref<1x128xf32, #tpu.memory_space<vmem>>, %arg9: memref<1x128xf32, #tpu.memory_space<vmem>>, %arg10: memref<128x128xf32, #tpu.memory_space<vmem>>, %arg11: memref<128x128xf32, #tpu.memory_space<vmem>>) attributes {dimension_semantics = [#tpu.dimension_semantics<parallel>, #tpu.dimension_semantics<arbitrary>], iteration_bounds = array<i64: 1, 1>, scalar_prefetch = 0 : i64, scratch_operands = 1 : i64, tpu.core_type = #tpu.core_type<tc>, window_params = [{transform_indices = @transform_0, window_bounds = array<i64: 128, 128>}, {transform_indices = @transform_1, window_bounds = array<i64: 128, 128>}, {transform_indices = @transform_2, window_bounds = array<i64: 128, 128>}, {transform_indices = @transform_3, window_bounds = array<i64: 128, 1>}, {pipeline_mode = #tpu.pipeline_mode<synchronous>, transform_indices = @transform_4, window_bounds = array<i64: 128, 128>}, {pipeline_mode = #tpu.pipeline_mode<synchronous>, transform_indices = @transform_5, window_bounds = array<i64: 1, 128>}, {pipeline_mode = #tpu.pipeline_mode<synchronous>, transform_indices = @transform_6, window_bounds = array<i64: 1, 128>}, {pipeline_mode = #tpu.pipeline_mode<synchronous>, transform_indices = @transform_7, window_bounds = array<i64: 1, 128>}, {transform_indices = @transform_8, window_bounds = array<i64: 128, 128>}]} {
    %c0_i32 = arith.constant 0 : i32
    %0 = arith.cmpi eq, %arg1, %c0_i32 : i32
    %1 = arith.extui %0 : i1 to i32
    %c0_i32_0 = arith.constant 0 : i32
    %2 = arith.cmpi ne, %1, %c0_i32_0 : i32
    scf.if %2 {
      %cst_10 = arith.constant 0.000000e+00 : f32
      %12 = vector.broadcast %cst_10 : f32 to vector<128x128xf32>
      %c0_11 = arith.constant 0 : index
      %c0_12 = arith.constant 0 : index
      %13 = vector.load %arg11[%c0_11, %c0_12] : memref<128x128xf32, #tpu.memory_space<vmem>>, vector<128x128xf32>
      tpu.vector_store %arg11[%c0_11, %c0_12], %12 {strides = array<i32>} : memref<128x128xf32, #tpu.memory_space<vmem>>, vector<128x128xf32>,
    } else {
    }
    %c0 = arith.constant 0 : index
    %c0_1 = arith.constant 0 : index
    %3 = vector.load %arg11[%c0, %c0_1] : memref<128x128xf32, #tpu.memory_space<vmem>>, vector<128x128xf32>
    %c0_2 = arith.constant 0 : index
    %c0_3 = arith.constant 0 : index
    %4 = vector.load %arg2[%c0_2, %c0_3] : memref<128x128xf32, #tpu.memory_space<vmem>>, vector<128x128xf32>
    %c0_4 = arith.constant 0 : index
    %c0_5 = arith.constant 0 : index
    %5 = vector.load %arg3[%c0_4, %c0_5] : memref<128x128xf32, #tpu.memory_space<vmem>>, vector<128x128xf32>
    %cst = arith.constant dense<0.000000e+00> : vector<128x128xf32>
    %6 = tpu.matmul %4, %5, %cst {dimension_numbers = #tpu.dot_dimension_numbers<[1], [0], [0], [1], [0, 0, 1, 1], [], []>} : vector<128x128xf32>, vector<128x128xf32>, vector<128x128xf32> -> vector<128x128xf32>
    %7 = arith.addf %3, %6 : vector<128x128xf32>
    %c0_6 = arith.constant 0 : index
    %c0_7 = arith.constant 0 : index
    %8 = vector.load %arg11[%c0_6, %c0_7] : memref<128x128xf32, #tpu.memory_space<vmem>>, vector<128x128xf32>
    tpu.vector_store %arg11[%c0_6, %c0_7], %7 {strides = array<i32>} : memref<128x128xf32, #tpu.memory_space<vmem>>, vector<128x128xf32>,
    %c0_i32_8 = arith.constant 0 : i32
    %9 = arith.cmpi eq, %arg1, %c0_i32_8 : i32
    %10 = arith.extui %9 : i1 to i32
    %c0_i32_9 = arith.constant 0 : i32
    %11 = arith.cmpi ne, %10, %c0_i32_9 : i32
    scf.if %11 {
      %c0_10 = arith.constant 0 : index
      %c0_11 = arith.constant 0 : index
      %12 = vector.load %arg4[%c0_10, %c0_11] : memref<128x128xf32, #tpu.memory_space<vmem>>, vector<128x128xf32>
      %c0_12 = arith.constant 0 : index
      %c0_13 = arith.constant 0 : index
      %13 = vector.load %arg5[%c0_12, %c0_13] : memref<128x1xf32, #tpu.memory_space<vmem>>, vector<128x1xf32>
      %c0_14 = arith.constant 0 : index
      %c0_15 = arith.constant 0 : index
      %14 = vector.load %arg11[%c0_14, %c0_15] : memref<128x128xf32, #tpu.memory_space<vmem>>, vector<128x128xf32>
      %15 = vector.broadcast %13 : vector<128x1xf32> to vector<128x128xf32>
      %16 = arith.mulf %15, %14 : vector<128x128xf32>
      %c0_16 = arith.constant 0 : index
      %c0_17 = arith.constant 0 : index
      %17 = vector.load %arg6[%c0_16, %c0_17] : memref<128x128xf32, #tpu.memory_space<vmem>>, vector<128x128xf32>
      %cst_18 = arith.constant dense<0.000000e+00> : vector<128x128xf32>
      %18 = tpu.matmul %12, %17, %cst_18 {dimension_numbers = #tpu.dot_dimension_numbers<[1], [0], [0], [1], [0, 0, 1, 1], [], []>} : vector<128x128xf32>, vector<128x128xf32>, vector<128x128xf32> -> vector<128x128xf32>
      %19 = arith.addf %16, %18 : vector<128x128xf32>
      %c0_19 = arith.constant 0 : index
      %c0_20 = arith.constant 0 : index
      %20 = vector.load %arg7[%c0_19, %c0_20] : memref<1x128xf32, #tpu.memory_space<vmem>>, vector<1x128xf32>
      %21 = vector.broadcast %20 : vector<1x128xf32> to vector<128x128xf32>
      %22 = arith.addf %19, %21 : vector<128x128xf32>
      %cst_21 = arith.constant 0.000000e+00 : f32
      %23 = vector.broadcast %cst_21 : f32 to vector<128x128xf32>
      %24 = arith.maximumf %22, %23 : vector<128x128xf32>
      %25 = arith.addf %24, %12 : vector<128x128xf32>
      %cst_22 = arith.constant dense<0.000000e+00> : vector<128xf32>
      %26 = vector.multi_reduction <add>, %25, %cst_22 [1] : vector<128x128xf32> to vector<128xf32>
      %27 = vector.shape_cast %26 : vector<128xf32> to vector<128x1xf32>
      %cst_23 = arith.constant 3.125000e-02 : f32
      %28 = vector.broadcast %cst_23 : f32 to vector<128x1xf32>
      %29 = arith.mulf %27, %28 : vector<128x1xf32>
      %30 = arith.mulf %25, %25 : vector<128x128xf32>
      %cst_24 = arith.constant dense<0.000000e+00> : vector<128xf32>
      %31 = vector.multi_reduction <add>, %30, %cst_24 [1] : vector<128x128xf32> to vector<128xf32>
      %32 = vector.shape_cast %31 : vector<128xf32> to vector<128x1xf32>
      %cst_25 = arith.constant 3.125000e-02 : f32
      %33 = vector.broadcast %cst_25 : f32 to vector<128x1xf32>
      %34 = arith.mulf %32, %33 : vector<128x1xf32>
      %35 = arith.mulf %29, %29 : vector<128x1xf32>
      %36 = arith.subf %34, %35 : vector<128x1xf32>
      %cst_26 = arith.constant 0.000000e+00 : f32
      %37 = vector.broadcast %cst_26 : f32 to vector<128x1xf32>
      %38 = arith.maximumf %36, %37 : vector<128x1xf32>
      %39 = vector.broadcast %29 : vector<128x1xf32> to vector<128x128xf32>
      %40 = arith.subf %25, %39 : vector<128x128xf32>
      %cst_27 = arith.constant 9.99999974E-6 : f32
      %41 = vector.broadcast %cst_27 : f32 to vector<128x1xf32>
      %42 = arith.addf %38, %41 : vector<128x1xf32>
      %43 = math.rsqrt %42 : vector<128x1xf32>
      %44 = vector.broadcast %43 : vector<128x1xf32> to vector<128x128xf32>
      %45 = arith.mulf %40, %44 : vector<128x128xf32>
      %c0_28 = arith.constant 0 : index
      %c0_29 = arith.constant 0 : index
      %46 = vector.load %arg8[%c0_28, %c0_29] : memref<1x128xf32, #tpu.memory_space<vmem>>, vector<1x128xf32>
      %47 = vector.broadcast %46 : vector<1x128xf32> to vector<128x128xf32>
      %48 = arith.mulf %45, %47 : vector<128x128xf32>
      %c0_30 = arith.constant 0 : index
      %c0_31 = arith.constant 0 : index
      %49 = vector.load %arg9[%c0_30, %c0_31] : memref<1x128xf32, #tpu.memory_space<vmem>>, vector<1x128xf32>
      %50 = vector.broadcast %49 : vector<1x128xf32> to vector<128x128xf32>
      %51 = arith.addf %48, %50 : vector<128x128xf32>
      %c0_32 = arith.constant 0 : index
      %c0_33 = arith.constant 0 : index
      %52 = vector.load %arg10[%c0_32, %c0_33] : memref<128x128xf32, #tpu.memory_space<vmem>>, vector<128x128xf32>
      tpu.vector_store %arg10[%c0_32, %c0_33], %51 {strides = array<i32>} : memref<128x128xf32, #tpu.memory_space<vmem>>, vector<128x128xf32>,
    } else {
    }
    return
  }
  func.func @transform_0(%arg0: i32, %arg1: i32) -> (i32, i32) {
    %c0_i32 = arith.constant 0 : i32
    return %arg0, %arg1 : i32, i32
  }
  func.func @transform_1(%arg0: i32, %arg1: i32) -> (i32, i32) {
    %c0_i32 = arith.constant 0 : i32
    %c0_i32_0 = arith.constant 0 : i32
    return %arg1, %c0_i32 : i32, i32
  }
  func.func @transform_2(%arg0: i32, %arg1: i32) -> (i32, i32) {
    %c0_i32 = arith.constant 0 : i32
    %c0_i32_0 = arith.constant 0 : i32
    return %arg0, %c0_i32 : i32, i32
  }
  func.func @transform_3(%arg0: i32, %arg1: i32) -> (i32, i32) {
    %c0_i32 = arith.constant 0 : i32
    %c0_i32_0 = arith.constant 0 : i32
    return %arg0, %c0_i32 : i32, i32
  }
  func.func @transform_4(%arg0: i32, %arg1: i32) -> (i32, i32) {
    %c0_i32 = arith.constant 0 : i32
    %c0_i32_0 = arith.constant 0 : i32
    %c0_i32_1 = arith.constant 0 : i32
    return %c0_i32, %c0_i32_0 : i32, i32
  }
  func.func @transform_5(%arg0: i32, %arg1: i32) -> (i32, i32) {
    %c0_i32 = arith.constant 0 : i32
    %c0_i32_0 = arith.constant 0 : i32
    %c0_i32_1 = arith.constant 0 : i32
    return %c0_i32, %c0_i32_0 : i32, i32
  }
  func.func @transform_6(%arg0: i32, %arg1: i32) -> (i32, i32) {
    %c0_i32 = arith.constant 0 : i32
    %c0_i32_0 = arith.constant 0 : i32
    %c0_i32_1 = arith.constant 0 : i32
    return %c0_i32, %c0_i32_0 : i32, i32
  }
  func.func @transform_7(%arg0: i32, %arg1: i32) -> (i32, i32) {
    %c0_i32 = arith.constant 0 : i32
    %c0_i32_0 = arith.constant 0 : i32
    %c0_i32_1 = arith.constant 0 : i32
    return %c0_i32, %c0_i32_0 : i32, i32
  }
  func.func @transform_8(%arg0: i32, %arg1: i32) -> (i32, i32) {
    %c0_i32 = arith.constant 0 : i32
    %c0_i32_0 = arith.constant 0 : i32
    return %arg0, %c0_i32 : i32, i32
  }
}

</mosaic_0001>

<bundles_post_ra>
// kernel: gcn_bs_forward.2
= control target key start
LH: loop header
LB: loop body
LE: loop exit
PB: predicated region body
PF: predicated region fallthrough
CT: control target
= control target key end

     0   :  { %v462_v3 = vmov 0   ;;  %s675_s1 = inlined_call_operand.vmem [shape: f32[128,128], index: 1, kind: input, shape index: {}]   ;;  %s676_s0 = inlined_call_operand.vmem [shape: f32[128,128], index: 0, kind: input, shape index: {}]   ;;  %s677_s2 = inlined_call_operand.vmem [shape: f32[128,1], index: 2, kind: input, shape index: {}]   ;;  %s678_s3 = inlined_call_operand.vmem [shape: f32[128,128], index: 3, kind: output, shape index: {}]  }
   0x1   :  { %v30_v0 = vld [vmem:[%s675_s1] sm:$0xff]  ;;  %v31_v1 = vld [vmem:[%s675_s1 + $0x8] sm:$0xff]  ;;  %v32_v2 = vld [vmem:[%s675_s1 + $0x10] sm:$0xff]  ;;  %461 = vset.pattern.permute.xlu1 %v462_v3  ;;  %460 = vset.pattern.permute.xlu0 %v462_v3 }
   0x2   :  { %v411_v4 = vpack.c.bf16 %v31_v1, %v30_v0  ;;  %v33_v5 = vld [vmem:[%s675_s1 + $0x18] sm:$0xff]  ;;  %v34_v7 = vld [vmem:[%s675_s1 + $0x20] sm:$0xff]  ;;  %v35_v8 = vld [vmem:[%s675_s1 + $0x28] sm:$0xff] }
   0x3   :  { %v415_v6 = vpack.c.bf16 %v33_v5, %v32_v2  ;;  %v419_v9 = vpack.c.bf16 %v35_v8, %v34_v7  ;;  %v14_v10 = vld [vmem:[%s676_s0] sm:$0xff]  ;;  %v36_v12 = vld [vmem:[%s675_s1 + $0x30] sm:$0xff]  ;;  %v37_v13 = vld [vmem:[%s675_s1 + $0x38] sm:$0xff] }
   0x4   :  { %412 = vmatprep.subr.bf16.mxu0 %v411_v4  ;;  %443 = vmatprep.subr.bf16.mxu1 %v411_v4  ;;  %v22_v11 = vld [vmem:[%s676_s0 + $0x40] sm:$0xff]  ;;  %v423_v14 = vpack.c.bf16 %v37_v13, %v36_v12  ;;  %v39_v16 = vld [vmem:[%s675_s1 + $0x48] sm:$0xff]  ;;  %v193_v17 = vld [vmem:[%s677_s2 + $0x10] sm:$0xff] }
   0x5   :  { %414 = vmatpush3.bf16.msra.mxu0 %v411_v4  ;;  %451 = vmatpush3.bf16.msra.mxu1 %v411_v4  ;;  %v38_v15 = vld [vmem:[%s675_s1 + $0x40] sm:$0xff]  ;;  %v194_v19 = vld [vmem:[%s677_s2 + $0x18] sm:$0xff]  ;;  %v40_v21 = vld [vmem:[%s675_s1 + $0x50] sm:$0xff] }
   0x6   :  { %416 = vmatprep.subr.bf16.mxu0 %v415_v6  ;;  %444 = vmatprep.subr.bf16.mxu1 %v415_v6  ;;  %v191_v18 = vld [vmem:[%s677_s2] sm:$0xff]  ;;  %v427_v20 = vpack.c.bf16 %v39_v16, %v38_v15  ;;  %v41_v22 = vld [vmem:[%s675_s1 + $0x58] sm:$0xff]  ;;  %v192_v23 = vld [vmem:[%s677_s2 + $0x8] sm:$0xff] }
   0x7   :  { %387 = vmatprep.mubr.f32.mxu0 %v14_v10  ;;  %399 = vmatprep.mubr.f32.mxu1 %v22_v11  ;;  %v196_v24 = vld [vmem:[%s677_s2 + $0x28] sm:$0xff]  ;;  %v431_v25 = vpack.c.bf16 %v41_v22, %v40_v21  ;;  %v42_v26 = vld [vmem:[%s675_s1 + $0x60] sm:$0xff]  ;;  %v198_v29 = vld [vmem:[%s677_s2 + $0x38] sm:$0xff] }
   0x8   :  { %219 = vperm.xlu1 %461, %v193_v17   ;;  %209 = vperm.xlu0 %460, %v191_v18   ;;  %v43_v27 = vld [vmem:[%s675_s1 + $0x68] sm:$0xff]  ;;  %v195_v28 = vld [vmem:[%s677_s2 + $0x20] sm:$0xff]  ;;  %v44_v31 = vld [vmem:[%s675_s1 + $0x70] sm:$0xff] }
   0x9   :  { %418 = vmatpush3.bf16.msra.mxu0 %v415_v6  ;;  %452 = vmatpush3.bf16.msra.mxu1 %v415_v6  ;;  %v435_v30 = vpack.c.bf16 %v43_v27, %v42_v26  ;;  %v45_v32 = vld [vmem:[%s675_s1 + $0x78] sm:$0xff]  ;;  %v197_v33 = vld [vmem:[%s677_s2 + $0x30] sm:$0xff]  ;;  %v200_v34 = vld [vmem:[%s677_s2 + $0x48] sm:$0xff] }
   0xa   :  { %420 = vmatprep.subr.bf16.mxu0 %v419_v9  ;;  %445 = vmatprep.subr.bf16.mxu1 %v419_v9  ;;  %v439_v35 = vpack.c.bf16 %v45_v32, %v44_v31  ;;  %v199_v36 = vld [vmem:[%s677_s2 + $0x40] sm:$0xff]  ;;  %v202_v37 = vld [vmem:[%s677_s2 + $0x58] sm:$0xff]  ;;  %v201_v38 = vld [vmem:[%s677_s2 + $0x50] sm:$0xff] }
   0xb   :  { %v15_v39 = vld [vmem:[%s676_s0 + $0x8] sm:$0xff]  ;;  %v16_v41 = vld [vmem:[%s676_s0 + $0x10] sm:$0xff]  ;;  %v203_v44 = vld [vmem:[%s677_s2 + $0x60] sm:$0xff] }
   0xc   :  { %224 = vperm.xlu1 %461, %v194_v19   ;;  %214 = vperm.xlu0 %460, %v192_v23   ;;  %v23_v40 = vld [vmem:[%s676_s0 + $0x48] sm:$0xff]  ;;  %v24_v42 = vld [vmem:[%s676_s0 + $0x50] sm:$0xff]  ;;  %v17_v45 = vld [vmem:[%s676_s0 + $0x18] sm:$0xff] }
   0xd   :  { %422 = vmatpush3.bf16.msra.mxu0 %v419_v9  ;;  %453 = vmatpush3.bf16.msra.mxu1 %v419_v9  ;;  %v204_v43 = vld [vmem:[%s677_s2 + $0x68] sm:$0xff]  ;;  %v25_v46 = vld [vmem:[%s676_s0 + $0x58] sm:$0xff]  ;;  %v18_v47 = vld [vmem:[%s676_s0 + $0x20] sm:$0xff] }
   0xe   :  { %424 = vmatprep.subr.bf16.mxu0 %v423_v14  ;;  %446 = vmatprep.subr.bf16.mxu1 %v423_v14  ;;  %v26_v48 = vld [vmem:[%s676_s0 + $0x60] sm:$0xff]  ;;  %v206_v49 = vld [vmem:[%s677_s2 + $0x78] sm:$0xff]  ;;  %v205_v50 = vld [vmem:[%s677_s2 + $0x70] sm:$0xff] }
   0xf   :  { %v19_v51 = vld [vmem:[%s676_s0 + $0x28] sm:$0xff]  ;;  %v20_v53 = vld [vmem:[%s676_s0 + $0x30] sm:$0xff]  ;;  %v21_v55 = vld [vmem:[%s676_s0 + $0x38] sm:$0xff] }
  0x10   :  { %234 = vperm.xlu1 %461, %v196_v24   ;;  %229 = vperm.xlu0 %460, %v195_v28   ;;  %v27_v52 = vld [vmem:[%s676_s0 + $0x68] sm:$0xff]  ;;  %v28_v54 = vld [vmem:[%s676_s0 + $0x70] sm:$0xff]  ;;  %v29_v56 = vld [vmem:[%s676_s0 + $0x78] sm:$0xff] }
  0x11   :  { %426 = vmatpush3.bf16.msra.mxu0 %v423_v14  ;;  %454 = vmatpush3.bf16.msra.mxu1 %v423_v14 }
  0x12   :  { %428 = vmatprep.subr.bf16.mxu0 %v427_v20  ;;  %447 = vmatprep.subr.bf16.mxu1 %v427_v20 }
  0x14   :  { %244 = vperm.xlu1 %461, %v198_v29   ;;  %239 = vperm.xlu0 %460, %v197_v33  }
  0x15   :  { %430 = vmatpush3.bf16.msra.mxu0 %v427_v20  ;;  %455 = vmatpush3.bf16.msra.mxu1 %v427_v20 }
  0x16   :  { %432 = vmatprep.subr.bf16.mxu0 %v431_v25  ;;  %448 = vmatprep.subr.bf16.mxu1 %v431_v25 }
  0x18   :  { %254 = vperm.xlu1 %461, %v200_v34   ;;  %249 = vperm.xlu0 %460, %v199_v36  }
  0x19   :  { %434 = vmatpush3.bf16.msra.mxu0 %v431_v25  ;;  %456 = vmatpush3.bf16.msra.mxu1 %v431_v25 }
  0x1a   :  { %436 = vmatprep.subr.bf16.mxu0 %v435_v30  ;;  %449 = vmatprep.subr.bf16.mxu1 %v435_v30 }
  0x1c   :  { %264 = vperm.xlu1 %461, %v202_v37   ;;  %259 = vperm.xlu0 %460, %v201_v38  }
  0x1d   :  { %438 = vmatpush3.bf16.msra.mxu0 %v435_v30  ;;  %457 = vmatpush3.bf16.msra.mxu1 %v435_v30 }
  0x1e   :  { %440 = vmatprep.subr.bf16.mxu0 %v439_v35  ;;  %450 = vmatprep.subr.bf16.mxu1 %v439_v35 }
  0x20   :  { %274 = vperm.xlu1 %461, %v204_v43   ;;  %269 = vperm.xlu0 %460, %v203_v44  }
  0x21   :  { %442 = vmatpush3.bf16.msra.mxu0 %v439_v35  ;;  %458 = vmatpush3.bf16.msra.mxu1 %v439_v35 }
  0x24   :  { %388 = vmatmul.mubr.f32.vlgmr.msra.gmra.mrb[0].mxu0 %v15_v39  ;;  %400 = vmatmul.mubr.f32.vlgmr.msra.gmra.mrb[0].mxu1 %v23_v40 }
  0x25   :  { %390 = vmatprep.mubr.f32.mxu0 %v16_v41  ;;  %402 = vmatprep.mubr.f32.mxu1 %v24_v42 }
  0x26   :  { %284 = vperm.xlu1 %461, %v206_v49   ;;  %279 = vperm.xlu0 %460, %v205_v50  }
  0x28   :  { %391 = vmatmul.mubr.f32.gmra.mrb[2].mxu0 %v17_v45  ;;  %403 = vmatmul.mubr.f32.gmra.mrb[2].mxu1 %v25_v46 }
  0x29   :  { %393 = vmatprep.mubr.f32.mxu0 %v18_v47  ;;  %405 = vmatprep.mubr.f32.mxu1 %v26_v48 }
  0x2c   :  { %394 = vmatmul.mubr.f32.gmra.mrb[4].mxu0 %v19_v51  ;;  %406 = vmatmul.mubr.f32.gmra.mrb[4].mxu1 %v27_v52 }
  0x2d   :  { %396 = vmatprep.mubr.f32.mxu0 %v20_v53  ;;  %408 = vmatprep.mubr.f32.mxu1 %v28_v54 }
  0x30   :  { %397 = vmatmul.mubr.f32.gmra.mrb[6].mxu0 %v21_v55  ;;  %409 = vmatmul.mubr.f32.gmra.mrb[6].mxu1 %v29_v56 }
  0x87   :  { %v220_v57 = vpop.permute.xlu1 %219  ;;  %v210_v58 = vpop.permute.xlu0 %209 }
  0x8b   :  { %v225_v59 = vpop.permute.xlu1 %224  ;;  %v215_v60 = vpop.permute.xlu0 %214 }
  0x8f   :  { %v235_v61 = vpop.permute.xlu1 %234  ;;  %v230_v62 = vpop.permute.xlu0 %229 }
  0x93   :  { %v245_v63 = vpop.permute.xlu1 %244  ;;  %v240_v0 = vpop.permute.xlu0 %239 }
  0x97   :  { %v255_v1 = vpop.permute.xlu1 %254  ;;  %v250_v2 = vpop.permute.xlu0 %249 }
  0x9b   :  { %v265_v3 = vpop.permute.xlu1 %264  ;;  %v260_v4 = vpop.permute.xlu0 %259 }
  0x9f   :  { %v275_v13 = vpop.permute.xlu1 %274  ;;  %v270_v14 = vpop.permute.xlu0 %269 }
  0xa5   :  { %v285_v31 = vpop.permute.xlu1 %284  ;;  %v280_v32 = vpop.permute.xlu0 %279 }
  0xf7   :  { %v389_v5 = vpop.f32.mrb[0].mxu0  ;;  %v401_v6 = vpop.f32.mrb[0].mxu1 }
  0xf8   :  { %v288_v7 = vmul.f32 %v389_v5, %v215_v60  ;;  %v296_v8 = vmul.f32 %v401_v6, %v255_v1  ;;  %v112_v9 = vpop.f32.mrb[1].mxu0  ;;  %v152_v10 = vpop.f32.mrb[1].mxu1 }
  0xf9   :  { %v287_v11 = vmul.f32 %v210_v58, %v112_v9  ;;  %v295_v12 = vmul.f32 %v250_v2, %v152_v10 }
  0xfa   :  { %304 = vst [vmem:[%s678_s3 + $0x8] sm:$0xff] %v288_v7  ;;  %312 = vst [vmem:[%s678_s3 + $0x48] sm:$0xff] %v296_v8 }
  0xfb   :  { %303 = vst [vmem:[%s678_s3] sm:$0xff] %v287_v11  ;;  %311 = vst [vmem:[%s678_s3 + $0x40] sm:$0xff] %v295_v12  ;;  %v392_v15 = vpop.f32.mrb[2].mxu0  ;;  %v404_v16 = vpop.f32.mrb[2].mxu1 }
  0xfc   :  { %v290_v17 = vmul.f32 %v392_v15, %v225_v59  ;;  %v298_v18 = vmul.f32 %v404_v16, %v265_v3  ;;  %v122_v19 = vpop.f32.mrb[3].mxu0  ;;  %v162_v20 = vpop.f32.mrb[3].mxu1 }
  0xfd   :  { %v289_v21 = vmul.f32 %v220_v57, %v122_v19  ;;  %v297_v22 = vmul.f32 %v260_v4, %v162_v20 }
  0xfe   :  { %306 = vst [vmem:[%s678_s3 + $0x18] sm:$0xff] %v290_v17  ;;  %314 = vst [vmem:[%s678_s3 + $0x58] sm:$0xff] %v298_v18 }
  0xff   :  { %305 = vst [vmem:[%s678_s3 + $0x10] sm:$0xff] %v289_v21  ;;  %313 = vst [vmem:[%s678_s3 + $0x50] sm:$0xff] %v297_v22  ;;  %v395_v23 = vpop.f32.mrb[4].mxu0  ;;  %v407_v24 = vpop.f32.mrb[4].mxu1 }
 0x100   :  { %v292_v25 = vmul.f32 %v395_v23, %v235_v61  ;;  %v300_v26 = vmul.f32 %v407_v24, %v275_v13  ;;  %v132_v27 = vpop.f32.mrb[5].mxu0  ;;  %v172_v28 = vpop.f32.mrb[5].mxu1 }
 0x101   :  { %v291_v29 = vmul.f32 %v230_v62, %v132_v27  ;;  %v299_v30 = vmul.f32 %v270_v14, %v172_v28 }
 0x102   :  { %308 = vst [vmem:[%s678_s3 + $0x28] sm:$0xff] %v292_v25  ;;  %316 = vst [vmem:[%s678_s3 + $0x68] sm:$0xff] %v300_v26 }
 0x103   :  { %307 = vst [vmem:[%s678_s3 + $0x20] sm:$0xff] %v291_v29  ;;  %315 = vst [vmem:[%s678_s3 + $0x60] sm:$0xff] %v299_v30  ;;  %v398_v33 = vpop.f32.mrb[6].mxu0  ;;  %v410_v34 = vpop.f32.mrb[6].mxu1 }
 0x104   :  { %v294_v35 = vmul.f32 %v398_v33, %v245_v63  ;;  %v302_v36 = vmul.f32 %v410_v34, %v285_v31  ;;  %v142_v37 = vpop.f32.mrb[7].mxu0  ;;  %v182_v38 = vpop.f32.mrb[7].mxu1 }
 0x105   :  { %v293_v39 = vmul.f32 %v240_v0, %v142_v37  ;;  %v301_v40 = vmul.f32 %v280_v32, %v182_v38 }
 0x106   :  { %310 = vst [vmem:[%s678_s3 + $0x38] sm:$0xff] %v294_v35  ;;  %318 = vst [vmem:[%s678_s3 + $0x78] sm:$0xff] %v302_v36 }
 0x107   :  { %309 = vst [vmem:[%s678_s3 + $0x30] sm:$0xff] %v293_v39  ;;  %317 = vst [vmem:[%s678_s3 + $0x70] sm:$0xff] %v301_v40 }

// kernel: gcn_bs_forward.3
= control target key start
LH: loop header
LB: loop body
LE: loop exit
PB: predicated region body
PF: predicated region fallthrough
CT: control target
= control target key end

     0   :  { %v1221_v3 = vmov 0   ;;  %s1843_s1 = inlined_call_operand.vmem [shape: f32[128,128], index: 1, kind: input, shape index: {}]   ;;  %s1844_s4 = inlined_call_operand.vmem [shape: f32[128,128], index: 4, kind: input, shape index: {}]   ;;  %s1845_s0 = inlined_call_operand.vmem [shape: f32[128,128], index: 0, kind: input, shape index: {}]   ;;  %s1846_s2 = inlined_call_operand.vmem [shape: f32[128,128], index: 2, kind: input, shape index: {}]   ;;  %s1847_s3 = inlined_call_operand.vmem [shape: f32[128,1], index: 3, kind: input, shape index: {}]   ;;  %s1848_s5 = inlined_call_operand.vmem [shape: f32[1,128], index: 5, kind: input, shape index: {}]   ;;  %s1849_s6 = inlined_call_operand.vmem [shape: f32[1,128], index: 6, kind: input, shape index: {}]   ;;  %s1850_s7 = inlined_call_operand.vmem [shape: f32[1,128], index: 7, kind: input, shape index: {}]   ;;  %s1851_s8 = inlined_call_operand.vmem [shape: f32[128,128], index: 8, kind: output, shape index: {}]  }
   0x1   :  { %v81_v0 = vld [vmem:[%s1843_s1] sm:$0xff]  ;;  %v82_v1 = vld [vmem:[%s1843_s1 + $0x8] sm:$0xff]  ;;  %1187 = vset.pattern.permute.xlu0 %v1221_v3  ;;  %1188 = vset.pattern.permute.xlu1 %v1221_v3  ;;  %v83_v6 = vld [vmem:[%s1843_s1 + $0x10] sm:$0xff] }
   0x2   :  { %v421_v2 = vld [vmem:[%s1844_s4] sm:$0xff]  ;;  %v1122_v4 = vpack.c.bf16 %v82_v1, %v81_v0  ;;  %v422_v5 = vld [vmem:[%s1844_s4 + $0x8] sm:$0xff]  ;;  %v84_v7 = vld [vmem:[%s1843_s1 + $0x18] sm:$0xff] }
   0x3   :  { %v1154_v8 = vpack.c.bf16 %v422_v5, %v421_v2  ;;  %v1126_v9 = vpack.c.bf16 %v84_v7, %v83_v6  ;;  %v423_v10 = vld [vmem:[%s1844_s4 + $0x10] sm:$0xff]  ;;  %v424_v11 = vld [vmem:[%s1844_s4 + $0x18] sm:$0xff]  ;;  %v85_v12 = vld [vmem:[%s1843_s1 + $0x20] sm:$0xff] }
   0x4   :  { %1123 = vmatprep.subr.bf16.mxu0 %v1122_v4  ;;  %v1158_v13 = vpack.c.bf16 %v424_v11, %v423_v10  ;;  %v86_v14 = vld [vmem:[%s1843_s1 + $0x28] sm:$0xff]  ;;  %v425_v15 = vld [vmem:[%s1844_s4 + $0x20] sm:$0xff]  ;;  %v87_v19 = vld [vmem:[%s1843_s1 + $0x30] sm:$0xff] }
   0x5   :  { %v426_v16 = vld [vmem:[%s1844_s4 + $0x28] sm:$0xff]  ;;  %1125 = vmatpush3.bf16.msra.mxu0 %v1122_v4  ;;  %1155 = vmatprep.subr.bf16.mxu1 %v1154_v8  ;;  %v1130_v17 = vpack.c.bf16 %v86_v14, %v85_v12  ;;  %v88_v20 = vld [vmem:[%s1843_s1 + $0x38] sm:$0xff]  ;;  %v427_v21 = vld [vmem:[%s1844_s4 + $0x30] sm:$0xff] }
   0x6   :  { %1157 = vmatpush3.bf16.msra.mxu1 %v1154_v8  ;;  %1127 = vmatprep.subr.bf16.mxu0 %v1126_v9  ;;  %v1162_v18 = vpack.c.bf16 %v426_v16, %v425_v15  ;;  %v428_v22 = vld [vmem:[%s1844_s4 + $0x38] sm:$0xff]  ;;  %v1134_v23 = vpack.c.bf16 %v88_v20, %v87_v19  ;;  %v89_v25 = vld [vmem:[%s1843_s1 + $0x40] sm:$0xff]  ;;  %v90_v26 = vld [vmem:[%s1843_s1 + $0x48] sm:$0xff] }
   0x7   :  { %1159 = vmatprep.subr.bf16.mxu1 %v1158_v13  ;;  %v1166_v24 = vpack.c.bf16 %v428_v22, %v427_v21  ;;  %v65_v27 = vld [vmem:[%s1845_s0] sm:$0xff]  ;;  %v430_v29 = vld [vmem:[%s1844_s4 + $0x48] sm:$0xff]  ;;  %v1138_v31 = vpack.c.bf16 %v90_v26, %v89_v25  ;;  %v91_v33 = vld [vmem:[%s1843_s1 + $0x50] sm:$0xff] }
   0x8   :  { %v429_v28 = vld [vmem:[%s1844_s4 + $0x40] sm:$0xff]  ;;  %1042 = vmatprep.mubr.f32.mxu0 %v65_v27  ;;  %v92_v34 = vld [vmem:[%s1843_s1 + $0x58] sm:$0xff]  ;;  %v431_v35 = vld [vmem:[%s1844_s4 + $0x50] sm:$0xff] }
   0x9   :  { %1129 = vmatpush3.bf16.msra.mxu0 %v1126_v9  ;;  %v1333_v30 = vld [vmem:[%s1846_s2] sm:$0xff]  ;;  %v1170_v32 = vpack.c.bf16 %v430_v29, %v429_v28  ;;  %v432_v36 = vld [vmem:[%s1844_s4 + $0x58] sm:$0xff]  ;;  %v1142_v37 = vpack.c.bf16 %v92_v34, %v91_v33  ;;  %v94_v40 = vld [vmem:[%s1843_s1 + $0x68] sm:$0xff] }
   0xa   :  { %1161 = vmatpush3.bf16.msra.mxu1 %v1158_v13  ;;  %1131 = vmatprep.subr.bf16.mxu0 %v1130_v17  ;;  %v1174_v38 = vpack.c.bf16 %v432_v36, %v431_v35  ;;  %v93_v39 = vld [vmem:[%s1843_s1 + $0x60] sm:$0xff]  ;;  %v434_v42 = vld [vmem:[%s1844_s4 + $0x68] sm:$0xff]  ;;  %v95_v46 = vld [vmem:[%s1843_s1 + $0x70] sm:$0xff] }
   0xb   :  { %1163 = vmatprep.subr.bf16.mxu1 %v1162_v18  ;;  %1098 = vmatprep.mubr.f32.mxu1 %v1333_v30  ;;  %v433_v41 = vld [vmem:[%s1844_s4 + $0x60] sm:$0xff]  ;;  %v1146_v43 = vpack.c.bf16 %v94_v40, %v93_v39  ;;  %v96_v47 = vld [vmem:[%s1843_s1 + $0x78] sm:$0xff]  ;;  %v295_v48 = vld [vmem:[%s1847_s3 + $0x10] sm:$0xff] }
   0xc   :  { %v293_v44 = vld [vmem:[%s1847_s3] sm:$0xff]  ;;  %v1178_v45 = vpack.c.bf16 %v434_v42, %v433_v41  ;;  %v435_v49 = vld [vmem:[%s1844_s4 + $0x70] sm:$0xff]  ;;  %v436_v50 = vld [vmem:[%s1844_s4 + $0x78] sm:$0xff]  ;;  %337 = vperm.xlu1 %1188, %v295_v48   ;;  %v1150_v53 = vpack.c.bf16 %v96_v47, %v95_v46 }
   0xd   :  { %1133 = vmatpush3.bf16.msra.mxu0 %v1130_v17  ;;  %327 = vperm.xlu0 %1187, %v293_v44   ;;  %v294_v51 = vld [vmem:[%s1847_s3 + $0x8] sm:$0xff]  ;;  %v296_v52 = vld [vmem:[%s1847_s3 + $0x18] sm:$0xff]  ;;  %v1182_v54 = vpack.c.bf16 %v436_v50, %v435_v49  ;;  %v297_v55 = vld [vmem:[%s1847_s3 + $0x20] sm:$0xff] }
   0xe   :  { %1165 = vmatpush3.bf16.msra.mxu1 %v1162_v18  ;;  %1135 = vmatprep.subr.bf16.mxu0 %v1134_v23  ;;  %v298_v56 = vld [vmem:[%s1847_s3 + $0x28] sm:$0xff]  ;;  %v299_v57 = vld [vmem:[%s1847_s3 + $0x30] sm:$0xff]  ;;  %v300_v59 = vld [vmem:[%s1847_s3 + $0x38] sm:$0xff] }
   0xf   :  { %1167 = vmatprep.subr.bf16.mxu1 %v1166_v24  ;;  %v66_v58 = vld [vmem:[%s1845_s0 + $0x8] sm:$0xff]  ;;  %v67_v61 = vld [vmem:[%s1845_s0 + $0x10] sm:$0xff]  ;;  %v301_v63 = vld [vmem:[%s1847_s3 + $0x40] sm:$0xff] }
  0x10   :  { %342 = vperm.xlu1 %1188, %v296_v52   ;;  %v1402_v60 = vld [vmem:[%s1846_s2 + $0x8] sm:$0xff]  ;;  %v1410_v62 = vld [vmem:[%s1846_s2 + $0x10] sm:$0xff]  ;;  %v68_v0 = vld [vmem:[%s1845_s0 + $0x18] sm:$0xff] }
  0x11   :  { %1137 = vmatpush3.bf16.msra.mxu0 %v1134_v23  ;;  %332 = vperm.xlu0 %1187, %v294_v51   ;;  %v302_v1 = vld [vmem:[%s1847_s3 + $0x48] sm:$0xff]  ;;  %v1426_v2 = vld [vmem:[%s1846_s2 + $0x18] sm:$0xff]  ;;  %v69_v3 = vld [vmem:[%s1845_s0 + $0x20] sm:$0xff] }
  0x12   :  { %1169 = vmatpush3.bf16.msra.mxu1 %v1166_v24  ;;  %1139 = vmatprep.subr.bf16.mxu0 %v1138_v31  ;;  %v1434_v4 = vld [vmem:[%s1846_s2 + $0x20] sm:$0xff]  ;;  %v303_v5 = vld [vmem:[%s1847_s3 + $0x50] sm:$0xff]  ;;  %v70_v6 = vld [vmem:[%s1845_s0 + $0x28] sm:$0xff] }
  0x13   :  { %1171 = vmatprep.subr.bf16.mxu1 %v1170_v32  ;;  %v304_v7 = vld [vmem:[%s1847_s3 + $0x58] sm:$0xff]  ;;  %v1450_v8 = vld [vmem:[%s1846_s2 + $0x28] sm:$0xff]  ;;  %v71_v9 = vld [vmem:[%s1845_s0 + $0x30] sm:$0xff] }
  0x14   :  { %352 = vperm.xlu1 %1188, %v298_v56   ;;  %v1458_v10 = vld [vmem:[%s1846_s2 + $0x30] sm:$0xff]  ;;  %v305_v11 = vld [vmem:[%s1847_s3 + $0x60] sm:$0xff]  ;;  %v72_v12 = vld [vmem:[%s1845_s0 + $0x38] sm:$0xff] }
  0x15   :  { %1141 = vmatpush3.bf16.msra.mxu0 %v1138_v31  ;;  %347 = vperm.xlu0 %1187, %v297_v55   ;;  %v306_v13 = vld [vmem:[%s1847_s3 + $0x68] sm:$0xff]  ;;  %v1474_v14 = vld [vmem:[%s1846_s2 + $0x38] sm:$0xff]  ;;  %v73_v15 = vld [vmem:[%s1845_s0 + $0x40] sm:$0xff] }
  0x16   :  { %1173 = vmatpush3.bf16.msra.mxu1 %v1170_v32  ;;  %1143 = vmatprep.subr.bf16.mxu0 %v1142_v37  ;;  %v1482_v16 = vld [vmem:[%s1846_s2 + $0x40] sm:$0xff]  ;;  %v307_v17 = vld [vmem:[%s1847_s3 + $0x70] sm:$0xff]  ;;  %v74_v18 = vld [vmem:[%s1845_s0 + $0x48] sm:$0xff] }
  0x17   :  { %1175 = vmatprep.subr.bf16.mxu1 %v1174_v38  ;;  %v308_v19 = vld [vmem:[%s1847_s3 + $0x78] sm:$0xff]  ;;  %v1498_v20 = vld [vmem:[%s1846_s2 + $0x48] sm:$0xff]  ;;  %v75_v21 = vld [vmem:[%s1845_s0 + $0x50] sm:$0xff] }
  0x18   :  { %362 = vperm.xlu1 %1188, %v300_v59   ;;  %v1506_v22 = vld [vmem:[%s1846_s2 + $0x50] sm:$0xff]  ;;  %v76_v23 = vld [vmem:[%s1845_s0 + $0x58] sm:$0xff]  ;;  %v77_v25 = vld [vmem:[%s1845_s0 + $0x60] sm:$0xff] }
  0x19   :  { %1145 = vmatpush3.bf16.msra.mxu0 %v1142_v37  ;;  %357 = vperm.xlu0 %1187, %v299_v57   ;;  %v1516_v24 = vld [vmem:[%s1846_s2 + $0x58] sm:$0xff]  ;;  %v1524_v26 = vld [vmem:[%s1846_s2 + $0x60] sm:$0xff]  ;;  %v78_v27 = vld [vmem:[%s1845_s0 + $0x68] sm:$0xff] }
  0x1a   :  { %1177 = vmatpush3.bf16.msra.mxu1 %v1174_v38  ;;  %1147 = vmatprep.subr.bf16.mxu0 %v1146_v43  ;;  %v1534_v28 = vld [vmem:[%s1846_s2 + $0x68] sm:$0xff]  ;;  %v79_v29 = vld [vmem:[%s1845_s0 + $0x70] sm:$0xff]  ;;  %v80_v32 = vld [vmem:[%s1845_s0 + $0x78] sm:$0xff] }
  0x1b   :  { %1179 = vmatprep.subr.bf16.mxu1 %v1178_v45  ;;  %v1542_v31 = vld [vmem:[%s1846_s2 + $0x70] sm:$0xff]  ;;  %v1552_v33 = vld [vmem:[%s1846_s2 + $0x78] sm:$0xff]  ;;  %v1558_v46 = vld [vmem:[%s1848_s5] ss:$0 sm:$0xff] }
  0x1c   :  { %372 = vperm.xlu1 %1188, %v302_v1  }
  0x1d   :  { %1149 = vmatpush3.bf16.msra.mxu0 %v1146_v43  ;;  %367 = vperm.xlu0 %1187, %v301_v63  }
  0x1e   :  { %1181 = vmatpush3.bf16.msra.mxu1 %v1178_v45  ;;  %1151 = vmatprep.subr.bf16.mxu0 %v1150_v53 }
  0x1f   :  { %1183 = vmatprep.subr.bf16.mxu1 %v1182_v54 }
  0x20   :  { %382 = vperm.xlu1 %1188, %v304_v7  }
  0x21   :  { %1153 = vmatpush3.bf16.msra.mxu0 %v1150_v53  ;;  %377 = vperm.xlu0 %1187, %v303_v5  }
  0x22   :  { %1185 = vmatpush3.bf16.msra.mxu1 %v1182_v54 }
  0x24   :  { %1043 = vmatmul.mubr.f32.vlgmr.msra.gmra.mrb[0].mxu0 %v66_v58  ;;  %392 = vperm.xlu1 %1188, %v306_v13  }
  0x25   :  { %1099 = vmatmul.mubr.f32.vlgmr.msra.gmra.mrb[0].mxu1 %v1402_v60  ;;  %1045 = vmatprep.mubr.f32.mxu0 %v67_v61 }
  0x26   :  { %1101 = vmatprep.mubr.f32.mxu1 %v1410_v62  ;;  %387 = vperm.xlu0 %1187, %v305_v11  }
  0x28   :  { %1046 = vmatmul.mubr.f32.gmra.mrb[2].mxu0 %v68_v0  ;;  %402 = vperm.xlu1 %1188, %v308_v19  }
  0x29   :  { %1102 = vmatmul.mubr.f32.gmra.mrb[2].mxu1 %v1426_v2  ;;  %1048 = vmatprep.mubr.f32.mxu0 %v69_v3 }
  0x2a   :  { %1104 = vmatprep.mubr.f32.mxu1 %v1434_v4  ;;  %397 = vperm.xlu0 %1187, %v307_v17  }
  0x2c   :  { %1049 = vmatmul.mubr.f32.gmra.mrb[4].mxu0 %v70_v6 }
  0x2d   :  { %1105 = vmatmul.mubr.f32.gmra.mrb[4].mxu1 %v1450_v8  ;;  %1051 = vmatprep.mubr.f32.mxu0 %v71_v9 }
  0x2e   :  { %1107 = vmatprep.mubr.f32.mxu1 %v1458_v10 }
  0x30   :  { %1052 = vmatmul.mubr.f32.gmra.mrb[6].mxu0 %v72_v12 }
  0x31   :  { %1108 = vmatmul.mubr.f32.gmra.mrb[6].mxu1 %v1474_v14  ;;  %1054 = vmatprep.mubr.f32.mxu0 %v73_v15 }
  0x32   :  { %1110 = vmatprep.mubr.f32.mxu1 %v1482_v16 }
  0x34   :  { %1055 = vmatmul.mubr.f32.gmra.mrb[8].mxu0 %v74_v18 }
  0x35   :  { %1111 = vmatmul.mubr.f32.gmra.mrb[8].mxu1 %v1498_v20  ;;  %1057 = vmatprep.mubr.f32.mxu0 %v75_v21 }
  0x36   :  { %1113 = vmatprep.mubr.f32.mxu1 %v1506_v22 }
  0x38   :  { %1058 = vmatmul.mubr.f32.gmra.mrb[10].mxu0 %v76_v23 }
  0x39   :  { %1114 = vmatmul.mubr.f32.gmra.mrb[10].mxu1 %v1516_v24  ;;  %1060 = vmatprep.mubr.f32.mxu0 %v77_v25 }
  0x3a   :  { %1116 = vmatprep.mubr.f32.mxu1 %v1524_v26 }
  0x3c   :  { %1061 = vmatmul.mubr.f32.gmra.mrb[12].mxu0 %v78_v27 }
  0x3d   :  { %1117 = vmatmul.mubr.f32.gmra.mrb[12].mxu1 %v1534_v28  ;;  %1063 = vmatprep.mubr.f32.mxu0 %v79_v29 }
  0x3e   :  { %1119 = vmatprep.mubr.f32.mxu1 %v1542_v31 }
  0x40   :  { %1064 = vmatmul.mubr.f32.gmra.mrb[14].mxu0 %v80_v32 }
  0x41   :  { %1120 = vmatmul.mubr.f32.gmra.mrb[14].mxu1 %v1552_v33 }
  0x8b   :  { %v338_v35 = vpop.permute.xlu1 %337 }
  0x8c   :  { %v328_v34 = vpop.permute.xlu0 %327 }
  0x8f   :  { %v343_v37 = vpop.permute.xlu1 %342 }
  0x90   :  { %v333_v36 = vpop.permute.xlu0 %332 }
  0x93   :  { %v353_v39 = vpop.permute.xlu1 %352 }
  0x94   :  { %v348_v38 = vpop.permute.xlu0 %347 }
  0x97   :  { %v363_v49 = vpop.permute.xlu1 %362 }
  0x98   :  { %v358_v44 = vpop.permute.xlu0 %357 }
  0x9b   :  { %v373_v12 = vpop.permute.xlu1 %372 }
  0x9c   :  { %v368_v63 = vpop.permute.xlu0 %367 }
  0xf7   :  { %v1044_v40 = vpop.f32.mrb[0].mxu0 }
  0xf8   :  { %v406_v41 = vmul.f32 %v1044_v40, %v333_v36  ;;  %v163_v42 = vpop.f32.mrb[1].mxu0  ;;  %v1100_v43 = vpop.f32.mrb[0].mxu1 }
  0xf9   :  { %v405_v45 = vmul.f32 %v328_v34, %v163_v42  ;;  %v503_v47 = vpop.f32.mrb[1].mxu1 }
  0xfa   :  { %v583_v48 = vadd.f32 %v1100_v43, %v406_v41  ;;  %v383_v41 = vpop.permute.xlu1 %382 }
  0xfb   :  { %v582_v50 = vadd.f32 %v503_v47, %v405_v45  ;;  %v1047_v51 = vpop.f32.mrb[2].mxu0 }
  0xfc   :  { %v606_v52 = vadd.f32 %v1558_v46, %v583_v48  ;;  %v408_v53 = vmul.f32 %v1047_v51, %v343_v37  ;;  %v173_v54 = vpop.f32.mrb[3].mxu0  ;;  %v1103_v55 = vpop.f32.mrb[2].mxu1 }
  0xfd   :  { %v605_v56 = vadd.f32 %v1558_v46, %v582_v50  ;;  %v407_v57 = vmul.f32 %v338_v35, %v173_v54  ;;  %v513_v58 = vpop.f32.mrb[3].mxu1  ;;  %v378_v35 = vpop.permute.xlu0 %377 }
  0xfe   :  { %v622_v59 = vmax.f32 %v606_v52, 0.0  ;;  %v585_v61 = vadd.f32 %v1103_v55, %v408_v53 }
  0xff   :  { %v621_v0 = vmax.f32 %v605_v56, 0.0  ;;  %v584_v1 = vadd.f32 %v513_v58, %v407_v57  ;;  %v1050_v3 = vpop.f32.mrb[4].mxu0 }
 0x100   :  { %v608_v5 = vadd.f32 %v1558_v46, %v585_v61  ;;  %v410_v6 = vmul.f32 %v1050_v3, %v353_v39  ;;  %v183_v7 = vpop.f32.mrb[5].mxu0  ;;  %v1106_v9 = vpop.f32.mrb[4].mxu1  ;;  %v1564_v11 = vadd.f32 %v622_v59, %v1402_v60 }
 0x101   :  { %v607_v13 = vadd.f32 %v1558_v46, %v584_v1  ;;  %v409_v15 = vmul.f32 %v348_v38, %v183_v7  ;;  %v523_v17 = vpop.f32.mrb[5].mxu1  ;;  %v1568_v18 = vadd.f32 %v621_v0, %v1333_v30  ;;  %v388_v53 = vpop.permute.xlu0 %387 }
 0x102   :  { %v587_v19 = vadd.f32 %v1106_v9, %v410_v6  ;;  %655 = vadd.xlane.f32.xlu1 %v1564_v11  ;;  %v624_v27 = vmax.f32 %v608_v5, 0.0  ;;  %v702_v39 = vmul.f32 %v1564_v11, %v1564_v11 }
 0x103   :  { %v623_v21 = vmax.f32 %v607_v13, 0.0  ;;  %v586_v23 = vadd.f32 %v523_v17, %v409_v15  ;;  %653 = vadd.xlane.f32.xlu0 %v1568_v18  ;;  %v1053_v25 = vpop.f32.mrb[6].mxu0  ;;  %v701_v60 = vmul.f32 %v1568_v18, %v1568_v18 }
 0x104   :  { %v412_v29 = vmul.f32 %v1053_v25, %v363_v49  ;;  %v193_v32 = vpop.f32.mrb[7].mxu0  ;;  %v1109_v34 = vpop.f32.mrb[6].mxu1  ;;  %v610_v0 = vadd.f32 %v1558_v46, %v587_v19 }
 0x105   :  { %v1575_v36 = vadd.f32 %v623_v21, %v1410_v62  ;;  %v609_v30 = vadd.f32 %v1558_v46, %v586_v23  ;;  %v411_v37 = vmul.f32 %v358_v44, %v193_v32  ;;  %v533_v38 = vpop.f32.mrb[7].mxu1  ;;  %v1583_v44 = vadd.f32 %v624_v27, %v1426_v2  ;;  %v398_v23 = vpop.permute.xlu0 %397 }
 0x106   :  { %v589_v40 = vadd.f32 %v1109_v34, %v412_v29  ;;  %717 = vadd.xlane.f32.xlu1 %v701_v60  ;;  %v626_v15 = vmax.f32 %v610_v0, 0.0 }
 0x107   :  { %v588_v42 = vadd.f32 %v533_v38, %v411_v37  ;;  %719 = vadd.xlane.f32.xlu0 %v702_v39  ;;  %v1056_v43 = vpop.f32.mrb[8].mxu0  ;;  %v703_v45 = vmul.f32 %v1575_v36, %v1575_v36  ;;  %v625_v47 = vmax.f32 %v609_v30, 0.0  ;;  %v704_v19 = vmul.f32 %v1583_v44, %v1583_v44 }
 0x108   :  { %v414_v48 = vmul.f32 %v1056_v43, %v373_v12  ;;  %v203_v62 = vpop.f32.mrb[9].mxu0  ;;  %v1112_v49 = vpop.f32.mrb[8].mxu1  ;;  %v612_v38 = vadd.f32 %v1558_v46, %v589_v40 }
 0x109   :  { %v413_v50 = vmul.f32 %v368_v63, %v203_v62  ;;  %v543_v51 = vpop.f32.mrb[9].mxu1  ;;  %v611_v56 = vadd.f32 %v1558_v46, %v588_v42  ;;  %v1588_v61 = vadd.f32 %v625_v47, %v1434_v4  ;;  %v393_v63 = vpop.permute.xlu1 %392  ;;  %v1603_v42 = vadd.f32 %v626_v15, %v1450_v8 }
 0x10a   :  { %v591_v52 = vadd.f32 %v1112_v49, %v414_v48  ;;  %721 = vadd.xlane.f32.xlu1 %v703_v45  ;;  %v628_v62 = vmax.f32 %v612_v38, 0.0 }
 0x10b   :  { %v590_v54 = vadd.f32 %v543_v51, %v413_v50  ;;  %659 = vadd.xlane.f32.xlu0 %v1583_v44  ;;  %v1059_v55 = vpop.f32.mrb[10].mxu0  ;;  %v627_v7 = vmax.f32 %v611_v56, 0.0  ;;  %v705_v4 = vmul.f32 %v1588_v61, %v1588_v61 }
 0x10c   :  { %v416_v57 = vmul.f32 %v1059_v55, %v383_v41  ;;  %v213_v58 = vpop.f32.mrb[11].mxu0  ;;  %v1115_v59 = vpop.f32.mrb[10].mxu1  ;;  %v614_v49 = vadd.f32 %v1558_v46, %v591_v52  ;;  %v1617_v50 = vadd.f32 %v628_v62, %v1474_v14 }
 0x10d   :  { %v415_v2 = vmul.f32 %v378_v35, %v213_v58  ;;  %v553_v1 = vpop.f32.mrb[11].mxu1  ;;  %v403_v60 = vpop.permute.xlu1 %402  ;;  %v613_v32 = vadd.f32 %v1558_v46, %v590_v54  ;;  %v1599_v37 = vadd.f32 %v627_v7, %v1458_v10  ;;  %v706_v10 = vmul.f32 %v1603_v42, %v1603_v42 }
 0x10e   :  { %v593_v3 = vadd.f32 %v1115_v59, %v416_v57  ;;  %661 = vadd.xlane.f32.xlu1 %v1588_v61  ;;  %v630_v54 = vmax.f32 %v614_v49, 0.0  ;;  %v708_v55 = vmul.f32 %v1617_v50, %v1617_v50 }
 0x10f   :  { %v592_v5 = vadd.f32 %v553_v1, %v415_v2  ;;  %657 = vadd.xlane.f32.xlu0 %v1575_v36  ;;  %v1062_v6 = vpop.f32.mrb[12].mxu0  ;;  %v629_v47 = vmax.f32 %v613_v32, 0.0  ;;  %v707_v48 = vmul.f32 %v1599_v37, %v1599_v37 }
 0x110   :  { %v418_v9 = vmul.f32 %v1062_v6, %v393_v63  ;;  %v223_v12 = vpop.f32.mrb[13].mxu0  ;;  %v1118_v13 = vpop.f32.mrb[12].mxu1  ;;  %v616_v14 = vadd.f32 %v1558_v46, %v593_v3  ;;  %v1631_v56 = vadd.f32 %v630_v54, %v1498_v20 }
 0x111   :  { %v417_v17 = vmul.f32 %v388_v53, %v223_v12  ;;  %v563_v21 = vpop.f32.mrb[13].mxu1  ;;  %v615_v40 = vadd.f32 %v1558_v46, %v592_v5  ;;  %v1613_v8 = vadd.f32 %v629_v47, %v1482_v16 }
 0x112   :  { %v595_v25 = vadd.f32 %v1118_v13, %v418_v9  ;;  %725 = vadd.xlane.f32.xlu1 %v705_v4  ;;  %v632_v59 = vmax.f32 %v616_v14, 0.0  ;;  %v710_v63 = vmul.f32 %v1631_v56, %v1631_v56 }
 0x113   :  { %v594_v27 = vadd.f32 %v563_v21, %v417_v17  ;;  %723 = vadd.xlane.f32.xlu0 %v704_v19  ;;  %v1065_v29 = vpop.f32.mrb[14].mxu0  ;;  %v631_v51 = vmax.f32 %v615_v40, 0.0  ;;  %v709_v53 = vmul.f32 %v1613_v8, %v1613_v8 }
 0x114   :  { %v420_v34 = vmul.f32 %v1065_v29, %v403_v60  ;;  %v233_v35 = vpop.f32.mrb[15].mxu0  ;;  %v1121_v30 = vpop.f32.mrb[14].mxu1  ;;  %v618_v20 = vadd.f32 %v1558_v46, %v595_v25  ;;  %v1645_v2 = vadd.f32 %v632_v59, %v1516_v24 }
 0x115   :  { %v419_v39 = vmul.f32 %v398_v23, %v233_v35  ;;  %v573_v41 = vpop.f32.mrb[15].mxu1  ;;  %v617_v16 = vadd.f32 %v1558_v46, %v594_v27  ;;  %v1627_v52 = vadd.f32 %v631_v51, %v1506_v22 }
 0x116   :  { %v597_v43 = vadd.f32 %v1121_v30, %v420_v34  ;;  %665 = vadd.xlane.f32.xlu1 %v1599_v37  ;;  %v634_v5 = vmax.f32 %v618_v20, 0.0  ;;  %v712_v6 = vmul.f32 %v1645_v2, %v1645_v2 }
 0x117   :  { %v596_v45 = vadd.f32 %v573_v41, %v419_v39  ;;  %663 = vadd.xlane.f32.xlu0 %v1603_v42  ;;  %v633_v57 = vmax.f32 %v617_v16, 0.0  ;;  %v711_v58 = vmul.f32 %v1627_v52, %v1627_v52 }
 0x118   :  { %v620_v24 = vadd.f32 %v1558_v46, %v597_v43  ;;  %v1658_v7 = vadd.f32 %v634_v5, %v1534_v28 }
 0x119   :  { %v619_v22 = vadd.f32 %v1558_v46, %v596_v45  ;;  %v1641_v0 = vadd.f32 %v633_v57, %v1524_v26 }
 0x11a   :  { %729 = vadd.xlane.f32.xlu1 %v707_v48  ;;  %v636_v12 = vmax.f32 %v620_v24, 0.0  ;;  %v714_v13 = vmul.f32 %v1658_v7, %v1658_v7 }
 0x11b   :  { %727 = vadd.xlane.f32.xlu0 %v706_v10  ;;  %v635_v1 = vmax.f32 %v619_v22, 0.0  ;;  %v713_v3 = vmul.f32 %v1641_v0, %v1641_v0 }
 0x11d   :  { %v1654_v26 = vadd.f32 %v635_v1, %v1542_v31  ;;  %v1667_v31 = vadd.f32 %v636_v12, %v1552_v33  ;;  %v1693_v12 = vld [vmem:[%s1849_s6] ss:$0 sm:$0xff] }
 0x11e   :  { %669 = vadd.xlane.f32.xlu1 %v1613_v8 }
 0x11f   :  { %667 = vadd.xlane.f32.xlu0 %v1617_v50  ;;  %v715_v9 = vmul.f32 %v1654_v26, %v1654_v26  ;;  %v716_v28 = vmul.f32 %v1667_v31, %v1667_v31 }
 0x122   :  { %733 = vadd.xlane.f32.xlu1 %v709_v53 }
 0x123   :  { %731 = vadd.xlane.f32.xlu0 %v708_v55 }
 0x126   :  { %673 = vadd.xlane.f32.xlu1 %v1627_v52 }
 0x127   :  { %671 = vadd.xlane.f32.xlu0 %v1631_v56 }
 0x12a   :  { %737 = vadd.xlane.f32.xlu1 %v711_v58 }
 0x12b   :  { %735 = vadd.xlane.f32.xlu0 %v710_v63 }
 0x12e   :  { %677 = vadd.xlane.f32.xlu1 %v1641_v0 }
 0x12f   :  { %675 = vadd.xlane.f32.xlu0 %v1645_v2 }
 0x132   :  { %741 = vadd.xlane.f32.xlu1 %v713_v3 }
 0x133   :  { %739 = vadd.xlane.f32.xlu0 %v712_v6 }
 0x136   :  { %681 = vadd.xlane.f32.xlu1 %v1654_v26 }
 0x137   :  { %679 = vadd.xlane.f32.xlu0 %v1658_v7 }
 0x13a   :  { %745 = vadd.xlane.f32.xlu1 %v715_v9 }
 0x13b   :  { %743 = vadd.xlane.f32.xlu0 %v714_v13 }
 0x13f   :  { %683 = vadd.xlane.f32.xlu0 %v1667_v31 }
 0x143   :  { %747 = vadd.xlane.f32.xlu0 %v716_v28 }
 0x18f   :  { %v656_v46 = vpop.xlane.xlu1 %655 }
 0x190   :  { %v654_v4 = vpop.xlane.xlu0 %653  ;;  %v686_v15 = vmul.f32 0.03125, %v656_v46 }
 0x191   :  { %v685_v17 = vmul.f32 0.03125, %v654_v4 }
 0x192   :  { %v766_v60 = vmul.f32 %v686_v15, %v686_v15  ;;  %v814_v9 = vsub.f32 %v1564_v11, %v686_v15 }
 0x193   :  { %v765_v21 = vmul.f32 %v685_v17, %v685_v17  ;;  %v718_v19 = vpop.xlane.xlu1 %717  ;;  %v813_v1 = vsub.f32 %v1568_v18, %v685_v17  ;;  %v1698_v18 = vld [vmem:[%s1850_s7] ss:$0 sm:$0xff] }
 0x194   :  { %v749_v23 = vmul.f32 0.03125, %v718_v19  ;;  %v720_v25 = vpop.xlane.xlu0 %719 }
 0x195   :  { %v750_v27 = vmul.f32 0.03125, %v720_v25 }
 0x196   :  { %v781_v29 = vsub.f32 %v749_v23, %v765_v21 }
 0x197   :  { %v782_v32 = vsub.f32 %v750_v27, %v766_v60  ;;  %v722_v33 = vpop.xlane.xlu1 %721 }
 0x198   :  { %v797_v34 = vmax.f32 %v781_v29, 0.0  ;;  %v660_v35 = vpop.xlane.xlu0 %659  ;;  %v751_v62 = vmul.f32 0.03125, %v722_v33 }
 0x199   :  { %v798_v30 = vmax.f32 %v782_v32, 0.0  ;;  %v1674_v47 = vmul.f32 0.03125, %v660_v35 }
 0x19a   :  { %v829_v38 = vadd.f32 1e-05, %v797_v34 }
 0x19b   :  { %v830_v39 = vadd.f32 1e-05, %v798_v30  ;;  %v662_v41 = vpop.xlane.xlu1 %661  ;;  %v768_v54 = vmul.f32 %v1674_v47, %v1674_v47 }
 0x19c   :  { %1189 = vrsqrt.f32 %v829_v38  ;;  %v1672_v43 = vmul.f32 0.03125, %v662_v41  ;;  %v658_v45 = vpop.xlane.xlu0 %657 }
 0x19d   :  { %1191 = vrsqrt.f32 %v830_v39  ;;  %v1676_v48 = vmul.f32 0.03125, %v658_v45 }
 0x19e   :  { %v769_v49 = vmul.f32 %v1672_v43, %v1672_v43 }
 0x19f   :  { %v767_v10 = vmul.f32 %v1676_v48, %v1676_v48  ;;  %v726_v40 = vpop.xlane.xlu1 %725 }
 0x1a0   :  { %v753_v51 = vmul.f32 0.03125, %v726_v40  ;;  %v724_v53 = vpop.xlane.xlu0 %723 }
 0x1a1   :  { %v783_v55 = vsub.f32 %v751_v62, %v767_v10  ;;  %v752_v16 = vmul.f32 0.03125, %v724_v53 }
 0x1a2   :  { %v785_v14 = vsub.f32 %v753_v51, %v769_v49  ;;  %v815_v49 = vsub.f32 %v1575_v36, %v1676_v48 }
 0x1a3   :  { %v799_v57 = vmax.f32 %v783_v55, 0.0  ;;  %v784_v58 = vsub.f32 %v752_v16, %v768_v54  ;;  %v666_v59 = vpop.xlane.xlu1 %665  ;;  %v817_v16 = vsub.f32 %v1588_v61, %v1672_v43 }
 0x1a4   :  { %v801_v63 = vmax.f32 %v785_v14, 0.0  ;;  %v1684_v22 = vmul.f32 0.03125, %v666_v59  ;;  %v664_v20 = vpop.xlane.xlu0 %663  ;;  %v816_v59 = vsub.f32 %v1583_v44, %v1674_v47 }
 0x1a5   :  { %v831_v3 = vadd.f32 1e-05, %v799_v57  ;;  %v800_v5 = vmax.f32 %v784_v58, 0.0  ;;  %v1687_v6 = vmul.f32 0.03125, %v664_v20 }
 0x1a6   :  { %v1190_v24 = vpop.eup %1189  ;;  %v833_v13 = vadd.f32 1e-05, %v801_v63  ;;  %v771_v11 = vmul.f32 %v1684_v22, %v1684_v22 }
 0x1a7   :  { %v1192_v28 = vpop.eup %1191  ;;  %v861_v46 = vmul.f32 %v1190_v24, %v813_v1  ;;  %1193 = vrsqrt.f32 %v831_v3  ;;  %v832_v4 = vadd.f32 1e-05, %v800_v5  ;;  %v730_v21 = vpop.xlane.xlu1 %729  ;;  %v770_v25 = vmul.f32 %v1687_v6, %v1687_v6 }
 0x1a8   :  { %v862_v17 = vmul.f32 %v1192_v28, %v814_v9  ;;  %1195 = vrsqrt.f32 %v833_v13  ;;  %v755_v15 = vmul.f32 0.03125, %v730_v21  ;;  %v728_v19 = vpop.xlane.xlu0 %727 }
 0x1a9   :  { %v884_v23 = vmul.f32 %v1693_v12, %v861_v46  ;;  %1197 = vrsqrt.f32 %v832_v4  ;;  %v754_v60 = vmul.f32 0.03125, %v728_v19 }
 0x1aa   :  { %v885_v27 = vmul.f32 %v1693_v12, %v862_v17  ;;  %v787_v29 = vsub.f32 %v755_v15, %v771_v11 }
 0x1ab   :  { %v907_v32 = vadd.f32 %v1698_v18, %v884_v23  ;;  %v786_v33 = vsub.f32 %v754_v60, %v770_v25  ;;  %v670_v34 = vpop.xlane.xlu1 %669  ;;  %v819_v60 = vsub.f32 %v1599_v37, %v1684_v22 }
 0x1ac   :  { %v908_v35 = vadd.f32 %v1698_v18, %v885_v27  ;;  %v803_v30 = vmax.f32 %v787_v29, 0.0  ;;  %v1708_v38 = vmul.f32 0.03125, %v670_v34  ;;  %v668_v39 = vpop.xlane.xlu0 %667 }
 0x1ad   :  { %923 = vst [vmem:[%s1851_s8] sm:$0xff] %v907_v32  ;;  %v802_v41 = vmax.f32 %v786_v33, 0.0  ;;  %v1713_v45 = vmul.f32 0.03125, %v668_v39  ;;  %v818_v33 = vsub.f32 %v1603_v42, %v1687_v6 }
 0x1ae   :  { %924 = vst [vmem:[%s1851_s8 + $0x8] sm:$0xff] %v908_v35  ;;  %v835_v62 = vadd.f32 1e-05, %v803_v30  ;;  %v773_v51 = vmul.f32 %v1708_v38, %v1708_v38 }
 0x1af   :  { %v834_v10 = vadd.f32 1e-05, %v802_v41  ;;  %v734_v40 = vpop.xlane.xlu1 %733  ;;  %v772_v14 = vmul.f32 %v1713_v45, %v1713_v45 }
 0x1b0   :  { %1199 = vrsqrt.f32 %v835_v62  ;;  %v757_v53 = vmul.f32 0.03125, %v734_v40  ;;  %v732_v54 = vpop.xlane.xlu0 %731 }
 0x1b1   :  { %v1194_v55 = vpop.eup %1193  ;;  %1201 = vrsqrt.f32 %v834_v10  ;;  %v756_v57 = vmul.f32 0.03125, %v732_v54 }
 0x1b2   :  { %v1196_v58 = vpop.eup %1195  ;;  %v863_v36 = vmul.f32 %v1194_v55, %v815_v49  ;;  %v789_v48 = vsub.f32 %v757_v53, %v773_v51 }
 0x1b3   :  { %v1198_v63 = vpop.eup %1197  ;;  %v865_v20 = vmul.f32 %v1196_v58, %v817_v16  ;;  %v788_v1 = vsub.f32 %v756_v57, %v772_v14  ;;  %v674_v3 = vpop.xlane.xlu1 %673 }
 0x1b4   :  { %v886_v5 = vmul.f32 %v1693_v12, %v863_v36  ;;  %v864_v24 = vmul.f32 %v1198_v63, %v816_v59  ;;  %v805_v9 = vmax.f32 %v789_v48, 0.0  ;;  %v1729_v61 = vmul.f32 0.03125, %v674_v3  ;;  %v672_v43 = vpop.xlane.xlu0 %671 }
 0x1b5   :  { %v888_v13 = vmul.f32 %v1693_v12, %v865_v20  ;;  %v804_v28 = vmax.f32 %v788_v1, 0.0  ;;  %v1732_v46 = vmul.f32 0.03125, %v672_v43  ;;  %v821_v59 = vsub.f32 %v1613_v8, %v1708_v38 }
 0x1b6   :  { %v909_v44 = vadd.f32 %v1698_v18, %v886_v5  ;;  %v887_v47 = vmul.f32 %v1693_v12, %v864_v24  ;;  %v837_v4 = vadd.f32 1e-05, %v805_v9  ;;  %v775_v19 = vmul.f32 %v1729_v61, %v1729_v61 }
 0x1b7   :  { %v911_v21 = vadd.f32 %v1698_v18, %v888_v13  ;;  %v836_v17 = vadd.f32 1e-05, %v804_v28  ;;  %v738_v11 = vpop.xlane.xlu1 %737  ;;  %v774_v27 = vmul.f32 %v1732_v46, %v1732_v46  ;;  %v820_v20 = vsub.f32 %v1617_v50, %v1713_v45 }
 0x1b8   :  { %925 = vst [vmem:[%s1851_s8 + $0x10] sm:$0xff] %v909_v44  ;;  %v910_v15 = vadd.f32 %v1698_v18, %v887_v47  ;;  %1203 = vrsqrt.f32 %v837_v4  ;;  %v759_v23 = vmul.f32 0.03125, %v738_v11  ;;  %v736_v25 = vpop.xlane.xlu0 %735 }
 0x1b9   :  { %927 = vst [vmem:[%s1851_s8 + $0x20] sm:$0xff] %v911_v21  ;;  %1205 = vrsqrt.f32 %v836_v17  ;;  %v758_v29 = vmul.f32 0.03125, %v736_v25  ;;  %v823_v25 = vsub.f32 %v1627_v52, %v1729_v61 }
 0x1ba   :  { %v1200_v32 = vpop.eup %1199  ;;  %926 = vst [vmem:[%s1851_s8 + $0x18] sm:$0xff] %v910_v15  ;;  %v791_v34 = vsub.f32 %v759_v23, %v775_v19 }
 0x1bb   :  { %v1202_v35 = vpop.eup %1201  ;;  %v867_v30 = vmul.f32 %v1200_v32, %v819_v60  ;;  %v790_v39 = vsub.f32 %v758_v29, %v774_v27  ;;  %v678_v41 = vpop.xlane.xlu1 %677  ;;  %v822_v32 = vsub.f32 %v1631_v56, %v1732_v46 }
 0x1bc   :  { %v866_v62 = vmul.f32 %v1202_v35, %v818_v33  ;;  %v807_v37 = vmax.f32 %v791_v34, 0.0  ;;  %v1755_v22 = vmul.f32 0.03125, %v678_v41  ;;  %v676_v10 = vpop.xlane.xlu0 %675 }
 0x1bd   :  { %v890_v40 = vmul.f32 %v1693_v12, %v867_v30  ;;  %v806_v49 = vmax.f32 %v790_v39, 0.0  ;;  %v1758_v51 = vmul.f32 0.03125, %v676_v10 }
 0x1be   :  { %v889_v53 = vmul.f32 %v1693_v12, %v866_v62  ;;  %v839_v54 = vadd.f32 1e-05, %v807_v37  ;;  %v777_v14 = vmul.f32 %v1755_v22, %v1755_v22  ;;  %v825_v46 = vsub.f32 %v1641_v0, %v1755_v22 }
 0x1bf   :  { %v913_v42 = vadd.f32 %v1698_v18, %v890_v40  ;;  %v838_v6 = vadd.f32 1e-05, %v806_v49  ;;  %v742_v55 = vpop.xlane.xlu1 %741  ;;  %v776_v36 = vmul.f32 %v1758_v51, %v1758_v51 }
 0x1c0   :  { %v912_v16 = vadd.f32 %v1698_v18, %v889_v53  ;;  %1207 = vrsqrt.f32 %v839_v54  ;;  %v761_v57 = vmul.f32 0.03125, %v742_v55  ;;  %v740_v58 = vpop.xlane.xlu0 %739 }
 0x1c1   :  { %929 = vst [vmem:[%s1851_s8 + $0x30] sm:$0xff] %v913_v42  ;;  %1209 = vrsqrt.f32 %v838_v6  ;;  %v760_v48 = vmul.f32 0.03125, %v740_v58 }
 0x1c2   :  { %v1204_v63 = vpop.eup %1203  ;;  %928 = vst [vmem:[%s1851_s8 + $0x28] sm:$0xff] %v912_v16  ;;  %v793_v1 = vsub.f32 %v761_v57, %v777_v14  ;;  %v824_v16 = vsub.f32 %v1645_v2, %v1758_v51 }
 0x1c3   :  { %v1206_v3 = vpop.eup %1205  ;;  %v869_v5 = vmul.f32 %v1204_v63, %v821_v59  ;;  %v792_v24 = vsub.f32 %v760_v48, %v776_v36  ;;  %v682_v9 = vpop.xlane.xlu1 %681 }
 0x1c4   :  { %v868_v43 = vmul.f32 %v1206_v3, %v820_v20  ;;  %v809_v8 = vmax.f32 %v793_v1, 0.0  ;;  %v1777_v38 = vmul.f32 0.03125, %v682_v9  ;;  %v680_v13 = vpop.xlane.xlu0 %679 }
 0x1c5   :  { %v892_v28 = vmul.f32 %v1693_v12, %v869_v5  ;;  %v808_v44 = vmax.f32 %v792_v24, 0.0  ;;  %v1780_v47 = vmul.f32 0.03125, %v680_v13 }
 0x1c6   :  { %v891_v4 = vmul.f32 %v1693_v12, %v868_v43  ;;  %v841_v21 = vadd.f32 1e-05, %v809_v8  ;;  %v779_v15 = vmul.f32 %v1777_v38, %v1777_v38  ;;  %v827_v2 = vsub.f32 %v1654_v26, %v1777_v38 }
 0x1c7   :  { %v915_v50 = vadd.f32 %v1698_v18, %v892_v28  ;;  %v840_v45 = vadd.f32 1e-05, %v808_v44  ;;  %v746_v17 = vpop.xlane.xlu1 %745  ;;  %v778_v60 = vmul.f32 %v1780_v47, %v1780_v47  ;;  %v826_v1 = vsub.f32 %v1658_v7, %v1780_v47 }
 0x1c8   :  { %v914_v11 = vadd.f32 %v1698_v18, %v891_v4  ;;  %1211 = vrsqrt.f32 %v841_v21  ;;  %v763_v19 = vmul.f32 0.03125, %v746_v17  ;;  %v744_v23 = vpop.xlane.xlu0 %743 }
 0x1c9   :  { %931 = vst [vmem:[%s1851_s8 + $0x40] sm:$0xff] %v915_v50  ;;  %1213 = vrsqrt.f32 %v840_v45  ;;  %v762_v27 = vmul.f32 0.03125, %v744_v23 }
 0x1ca   :  { %v1208_v29 = vpop.eup %1207  ;;  %930 = vst [vmem:[%s1851_s8 + $0x38] sm:$0xff] %v914_v11  ;;  %v795_v33 = vsub.f32 %v763_v19, %v779_v15 }
 0x1cb   :  { %v1210_v34 = vpop.eup %1209  ;;  %v871_v35 = vmul.f32 %v1208_v29, %v823_v25  ;;  %v794_v30 = vsub.f32 %v762_v27, %v778_v60 }
 0x1cc   :  { %v870_v39 = vmul.f32 %v1210_v34, %v822_v32  ;;  %v811_v41 = vmax.f32 %v795_v33, 0.0  ;;  %v684_v52 = vpop.xlane.xlu0 %683 }
 0x1cd   :  { %v894_v61 = vmul.f32 %v1693_v12, %v871_v35  ;;  %v810_v62 = vmax.f32 %v794_v30, 0.0  ;;  %v700_v37 = vmul.f32 0.03125, %v684_v52 }
 0x1ce   :  { %v893_v10 = vmul.f32 %v1693_v12, %v870_v39  ;;  %v843_v40 = vadd.f32 1e-05, %v811_v41 }
 0x1cf   :  { %v917_v49 = vadd.f32 %v1698_v18, %v894_v61  ;;  %v842_v53 = vadd.f32 1e-05, %v810_v62  ;;  %v780_v42 = vmul.f32 %v700_v37, %v700_v37  ;;  %v828_v7 = vsub.f32 %v1667_v31, %v700_v37 }
 0x1d0   :  { %v916_v54 = vadd.f32 %v1698_v18, %v893_v10  ;;  %1215 = vrsqrt.f32 %v843_v40  ;;  %v748_v56 = vpop.xlane.xlu0 %747 }
 0x1d1   :  { %933 = vst [vmem:[%s1851_s8 + $0x50] sm:$0xff] %v917_v49  ;;  %1217 = vrsqrt.f32 %v842_v53  ;;  %v764_v6 = vmul.f32 0.03125, %v748_v56 }
 0x1d2   :  { %v1212_v55 = vpop.eup %1211  ;;  %932 = vst [vmem:[%s1851_s8 + $0x48] sm:$0xff] %v916_v54 }
 0x1d3   :  { %v1214_v14 = vpop.eup %1213  ;;  %v873_v57 = vmul.f32 %v1212_v55, %v825_v46  ;;  %v796_v58 = vsub.f32 %v764_v6, %v780_v42 }
 0x1d4   :  { %v872_v59 = vmul.f32 %v1214_v14, %v824_v16 }
 0x1d5   :  { %v896_v36 = vmul.f32 %v1693_v12, %v873_v57  ;;  %v812_v48 = vmax.f32 %v796_v58, 0.0 }
 0x1d6   :  { %v895_v0 = vmul.f32 %v1693_v12, %v872_v59 }
 0x1d7   :  { %v919_v22 = vadd.f32 %v1698_v18, %v896_v36  ;;  %v844_v63 = vadd.f32 1e-05, %v812_v48 }
 0x1d8   :  { %v918_v20 = vadd.f32 %v1698_v18, %v895_v0 }
 0x1d9   :  { %935 = vst [vmem:[%s1851_s8 + $0x60] sm:$0xff] %v919_v22  ;;  %1219 = vrsqrt.f32 %v844_v63 }
 0x1da   :  { %v1216_v51 = vpop.eup %1215  ;;  %934 = vst [vmem:[%s1851_s8 + $0x58] sm:$0xff] %v918_v20 }
 0x1db   :  { %v1218_v3 = vpop.eup %1217  ;;  %v875_v5 = vmul.f32 %v1216_v51, %v827_v2 }
 0x1dc   :  { %v874_v24 = vmul.f32 %v1218_v3, %v826_v1 }
 0x1dd   :  { %v898_v9 = vmul.f32 %v1693_v12, %v875_v5 }
 0x1de   :  { %v897_v43 = vmul.f32 %v1693_v12, %v874_v24 }
 0x1df   :  { %v921_v8 = vadd.f32 %v1698_v18, %v898_v9 }
 0x1e0   :  { %v920_v26 = vadd.f32 %v1698_v18, %v897_v43 }
 0x1e1   :  { %937 = vst [vmem:[%s1851_s8 + $0x70] sm:$0xff] %v921_v8 }
 0x1e2   :  { %936 = vst [vmem:[%s1851_s8 + $0x68] sm:$0xff] %v920_v26 }
 0x1e3   :  { %v1220_v38 = vpop.eup %1219 }
 0x1e4   :  { %v876_v13 = vmul.f32 %v1220_v38, %v828_v7 }
 0x1e6   :  { %v899_v28 = vmul.f32 %v1693_v12, %v876_v13 }
 0x1e8   :  { %v922_v44 = vadd.f32 %v1698_v18, %v899_v28 }
 0x1ea   :  { %938 = vst [vmem:[%s1851_s8 + $0x78] sm:$0xff] %v922_v44 }

</bundles_post_ra>
